<compile_context>
chip_gen: v5e
topology: v5e:2x2
jax: 0.10.0
libtpu: 0.0.40
codegen_flags: <defaults>
</compile_context>

<pallas_src>
import functools

import jax
import jax.numpy as jnp
from jax.experimental import pallas as pl
from jax.experimental.pallas import tpu as pltpu


def _round_up(x, m):
    return ((x + m - 1) // m) * m


def gvp_message_kernel(slab_ref, wvmix_ref, wdense_ref, bcat_ref, out_ref,
                       *, num_gvps, s_dim, v_dim, v_pad):
    """One tile of TN messages (N on lanes); all GVP layers applied in-kernel.

    slab rows: 0..S-1 scalars, S..S+3V-1 vectors (d-major, row = S + d*V + c).
    """
    S, V, Vp = s_dim, v_dim, v_pad
    G = 2 * V                      # interleaved per-d group size [vs_d; vv_d]
    M1 = 3 * Vp                    # rows of the padded-d-major vv block

    slab = slab_ref[...].astype(jnp.float32)          # (S + 3V, TN)
    tn = slab.shape[-1]
    s = slab[0:S]                                      # (S, TN)
    v_in = slab[S:S + 3 * V]                           # (3V, TN) compact d-major

    # Internal carried layout for v: padded d-major (row = d*Vp + c, zero rows
    # for c >= V).  Built once per tile so every per-layer op is 8-aligned.
    if Vp == V:
        v = v_in
    else:
        zpad = jnp.zeros((Vp - V, tn), jnp.float32)
        pieces = []
        for d in range(3):
            pieces.append(v_in[d * V:(d + 1) * V])
            pieces.append(zpad)
        v = jnp.concatenate(pieces, axis=0)            # (3*Vp, TN)

    for l in range(num_gvps):                          # small L -> static unroll
        W_vmix = wvmix_ref[l]                          # (3*Vp + 6V, 3*Vp)
        W_dense = wdense_ref[l]                        # (S + Vp, S + 2V)
        b_cat = bcat_ref[l]                            # (S + Vp, 1)

        # One MXU dot for both channel mixes.
        mix = jnp.dot(W_vmix, v, precision=jax.lax.Precision.HIGHEST,
                      preferred_element_type=jnp.float32)   # (3Vp + 6V, TN)
        vv = mix[0:M1]                                 # (3Vp, TN) padded d-major
        q = mix[M1:]                                   # (6V, TN) per-d [vs_d; vv_d]

        # Both sums-of-squares in one aligned slab, one sqrt:
        # rows 0..V-1 = |vs| pre-sqrt, rows V..2V-1 = |vv| pre-sqrt.
        ss = (q[0:G] * q[0:G] + q[G:2 * G] * q[G:2 * G]
              + q[2 * G:3 * G] * q[2 * G:3 * G])       # (2V, TN)
        norms = jnp.sqrt(ss)                           # (2V, TN)

        # One dense dot for new_s (rows 0..S-1) and the gate (rows S..S+V-1).
        dense_in = jnp.concatenate([s, norms], axis=0)          # (S + 2V, TN)
        pre = jnp.dot(W_dense, dense_in, precision=jax.lax.Precision.HIGHEST,
                      preferred_element_type=jnp.float32) + b_cat  # (S+Vp, TN)

        s = jnp.maximum(pre[0:S], 0.0)                 # ReLU
        gate = jax.nn.sigmoid(pre[S:S + Vp])           # (Vp, TN); dummy rows = 0.5
        gate3 = jnp.concatenate([gate, gate, gate], axis=0)     # (3Vp, TN)
        v = gate3 * vv                                 # padded channels stay 0

    # Compact back to (3V, TN) d-major and store one lane-dense slab.
    if Vp == V:
        v_out = v
    else:
        v_out = jnp.concatenate([v[d * Vp:d * Vp + V] for d in range(3)], axis=0)
    out = jnp.concatenate([s, v_out], axis=0)          # (S + 3V, TN)
    out_ref[...] = out.astype(out_ref.dtype)


def gvp_message(scalars, vectors, params, *, num_gvps, tile_n=8192):
    """scalars: (N, S), vectors: (N, V, 3) (PyTorch convention). Returns same shapes."""
    N, S = scalars.shape
    _, V, _ = vectors.shape
    Ws, Wv, Wsc, bsc, Wvg, bvg = params
    L = num_gvps
    Vp = _round_up(V, 8)            # internal sublane-aligned vector channels

    # ---- tile selection (review: big tiles; >=2 steps for v7x megacore) ----
    tile_n = max(128, (tile_n // 128) * 128)
    np_min = _round_up(N, 128)
    tile_n = min(tile_n, np_min)
    if np_min <= tile_n and np_min >= 2048:
        # Split into >=2 grid steps (>=1024 lanes each) so both v7x TensorCores
        # get work; on v5e/v6e the extra step overhead is negligible at this size.
        tile_n = _round_up((np_min + 1) // 2, 128)
    Np = _round_up(N, tile_n)       # pad instead of dropping tail rows

    rows = S + 3 * V
    io_dtype = scalars.dtype        # keep f32 I/O for fp32 parity; bf16 I/O is a
                                    # further ~1.7-2x HBM win on v5e/v6e if tolerable.

    # ---- fused channel-major I/O slab (N on the lane axis) ----
    # TODO(synk): if the upstream producer can emit channel-major (S, N)/(3V, N)
    # tensors directly, drop these wrapper transposes (each is an extra HBM pass).
    slab = jnp.zeros((rows, Np), io_dtype)
    slab = slab.at[:S, :N].set(scalars.T.astype(io_dtype))
    slab = slab.at[S:, :N].set(
        jnp.transpose(vectors, (2, 1, 0)).reshape(3 * V, N).astype(io_dtype))

    # ---- host-side weight prep (tiny; constant-folded under jit) ----
    f32 = jnp.float32
    M1 = 3 * Vp
    W_vmix = jnp.zeros((L, M1 + 6 * V, 3 * Vp), f32)
    for d in range(3):
        cols = slice(d * Vp, d * Vp + V)               # real input channels, spatial d
        # vv in padded d-major layout (carried to the gating multiply / next layer)
        W_vmix = W_vmix.at[:, d * Vp:d * Vp + V, cols].set(Wv)
        # interleaved [vs_d; vv_d] copy used only for the norms
        base = M1 + d * 2 * V
        W_vmix = W_vmix.at[:, base:base + V, cols].set(Ws)
        W_vmix = W_vmix.at[:, base + V:base + 2 * V, cols].set(Wv)

    # Dense dot: rows 0..S-1 -> new_s, rows S..S+V-1 -> gate, rest zero (dummy).
    W_dense = jnp.zeros((L, S + Vp, S + 2 * V), f32)
    W_dense = W_dense.at[:, 0:S, 0:S].set(Wsc[:, :, 0:S])
    W_dense = W_dense.at[:, 0:S, S:S + V].set(Wsc[:, :, S:S + V])
    W_dense = W_dense.at[:, S:S + V, 0:S].set(Wvg[:, :, 0:S])
    W_dense = W_dense.at[:, S:S + V, S + V:S + 2 * V].set(Wvg[:, :, S:S + V])

    b_cat = jnp.zeros((L, S + Vp, 1), f32)
    b_cat = b_cat.at[:, 0:S, 0].set(bsc[:, 0, :])
    b_cat = b_cat.at[:, S:S + V, 0].set(bvg[:, 0, :])

    def resident(arr):
        nd = arr.ndim
        return pl.BlockSpec(arr.shape, lambda i, _n=nd: (0,) * _n)

    kernel = functools.partial(gvp_message_kernel, num_gvps=L, s_dim=S,
                               v_dim=V, v_pad=Vp)

    itemsize = jnp.dtype(io_dtype).itemsize
    cost = pl.CostEstimate(
        flops=2 * L * Np * ((M1 + 6 * V) * 3 * Vp + (S + Vp) * (S + 2 * V)),
        transcendentals=L * Np * (2 * V + Vp),          # sqrt + sigmoid
        bytes_accessed=2 * rows * Np * itemsize
        + int(W_vmix.size + W_dense.size + b_cat.size) * 4,
    )

    out = pl.pallas_call(
        kernel,
        out_shape=jax.ShapeDtypeStruct((rows, Np), io_dtype),
        grid_spec=pltpu.PrefetchScalarGridSpec(
            num_scalar_prefetch=0,
            grid=(Np // tile_n,),
            in_specs=[
                pl.BlockSpec((rows, tile_n), lambda i: (0, i)),
                resident(W_vmix), resident(W_dense), resident(b_cat),
            ],
            out_specs=pl.BlockSpec((rows, tile_n), lambda i: (0, i)),
        ),
        compiler_params=pltpu.CompilerParams(dimension_semantics=("parallel",)),
        cost_estimate=cost,
    )(slab, W_vmix, W_dense, b_cat)

    s_final = out[:S, :N].T.astype(scalars.dtype)
    v_final = jnp.transpose(out[S:, :N].reshape(3, V, N), (2, 1, 0)).astype(vectors.dtype)
    return s_final, v_final


def gvp_message_ref(scalars, vectors, params, num_gvps):
    """Pure-JAX reference matching the PyTorch forward exactly (fp32 precision)."""
    Ws, Wv, Wsc, bsc, Wvg, bvg = params
    hp = jax.lax.Precision.HIGHEST
    s = scalars.astype(jnp.float32)
    v = vectors.astype(jnp.float32)                     # (N, V, 3)
    for l in range(num_gvps):
        vs = jnp.einsum('pq,nqd->npd', Ws[l], v, precision=hp)
        vv = jnp.einsum('pq,nqd->npd', Wv[l], v, precision=hp)
        ns = jnp.linalg.norm(vs, axis=-1)
        nv = jnp.linalg.norm(vv, axis=-1)
        fs = jnp.concatenate([s, ns], axis=-1)
        fv = jnp.concatenate([s, nv], axis=-1)
        s = jax.nn.relu(jnp.dot(fs, Wsc[l].T, precision=hp) + bsc[l, 0])
        gate = jax.nn.sigmoid(jnp.dot(fv, Wvg[l].T, precision=hp) + bvg[l, 0])
        v = gate[..., None] * vv
    return s, v


def make_params(key, num_gvps, S, V):
    """Deterministic synthetic parameters (shapes follow GeometricVectorPerceptron.__init__).
    h_dim = max(V, V) = V, so W_vec_for_scalar is (V, V)."""
    ks = jax.random.split(key, 6)
    Ws = 0.3 * jax.random.normal(ks[0], (num_gvps, V, V), jnp.float32)
    Wv = 0.3 * jax.random.normal(ks[1], (num_gvps, V, V), jnp.float32)
    Wsc = 0.3 * jax.random.normal(ks[2], (num_gvps, S, S + V), jnp.float32)
    bsc = 0.1 * jax.random.normal(ks[3], (num_gvps, 1, S), jnp.float32)
    Wvg = 0.3 * jax.random.normal(ks[4], (num_gvps, V, S + V), jnp.float32)
    bvg = 0.1 * jax.random.normal(ks[5], (num_gvps, 1, V), jnp.float32)
    return Ws, Wv, Wsc, bsc, Wvg, bvg


if __name__ == "__main__":
    key = jax.random.PRNGKey(0)
    k_s, k_v, k_p, k_s2, k_v2, k_p2 = jax.random.split(key, 6)

    # ---- primary small test (matches the module's intended use) ----
    N, S, V, L = 16, 8, 4, 2        # messages, scalar ch, vector ch, num_gvps
    scalars = jax.random.normal(k_s, (N, S), jnp.float32)
    vectors = jax.random.normal(k_v, (N, V, 3), jnp.float32)
    params = make_params(k_p, L, S, V)

    s_out, v_out = gvp_message(scalars, vectors, params, num_gvps=L)
    jax.block_until_ready(s_out)
    jax.block_until_ready(v_out)

    s_ref, v_ref = gvp_message_ref(scalars, vectors, params, L)
    assert s_out.shape == (N, S) and v_out.shape == (N, V, 3)
    assert jnp.allclose(s_out, s_ref, atol=1e-4, rtol=1e-4)
    assert jnp.allclose(v_out, v_ref, atol=1e-4, rtol=1e-4)

    # ---- secondary test: multi-step grid + lane padding path ----
    N2, L2 = 300, 3
    scalars2 = jax.random.normal(k_s2, (N2, S), jnp.float32)
    vectors2 = jax.random.normal(k_v2, (N2, V, 3), jnp.float32)
    params2 = make_params(k_p2, L2, S, V)

    s_out2, v_out2 = gvp_message(scalars2, vectors2, params2, num_gvps=L2, tile_n=128)
    jax.block_until_ready(s_out2)
    s_ref2, v_ref2 = gvp_message_ref(scalars2, vectors2, params2, L2)
    assert jnp.allclose(s_out2, s_ref2, atol=1e-4, rtol=1e-4)
    assert jnp.allclose(v_out2, v_ref2, atol=1e-4, rtol=1e-4)

    print("KERNEL_OK")
</pallas_src>

<mosaic_0001>
module attributes {stable_mosaic.version = 11 : i64} {
  func.func @gvp_message_kernel(%arg0: i32, %arg1: memref<20x128xf32, #tpu.memory_space<vmem>>, %arg2: memref<2x48x24xf32, #tpu.memory_space<vmem>>, %arg3: memref<2x16x16xf32, #tpu.memory_space<vmem>>, %arg4: memref<2x16x1xf32, #tpu.memory_space<vmem>>, %arg5: memref<20x128xf32, #tpu.memory_space<vmem>>) attributes {dimension_semantics = [#tpu.dimension_semantics<parallel>], iteration_bounds = array<i64: 1>, scalar_prefetch = 0 : i64, scratch_operands = 0 : i64, tpu.core_type = #tpu.core_type<tc>, window_params = [{transform_indices = @transform_0, window_bounds = array<i64: 20, 128>}, {pipeline_mode = #tpu.pipeline_mode<synchronous>, transform_indices = @transform_1, window_bounds = array<i64: 2, 48, 24>}, {pipeline_mode = #tpu.pipeline_mode<synchronous>, transform_indices = @transform_2, window_bounds = array<i64: 2, 16, 16>}, {pipeline_mode = #tpu.pipeline_mode<synchronous>, transform_indices = @transform_3, window_bounds = array<i64: 2, 16, 1>}, {transform_indices = @transform_4, window_bounds = array<i64: 20, 128>}]} {
    %c0 = arith.constant 0 : index
    %c0_0 = arith.constant 0 : index
    %0 = vector.load %arg1[%c0, %c0_0] : memref<20x128xf32, #tpu.memory_space<vmem>>, vector<20x128xf32>
    %1 = vector.extract_strided_slice %0 {offsets = [0, 0], sizes = [8, 128], strides = [1, 1]} : vector<20x128xf32> to vector<8x128xf32>
    %2 = vector.extract_strided_slice %0 {offsets = [8, 0], sizes = [12, 128], strides = [1, 1]} : vector<20x128xf32> to vector<12x128xf32>
    %cst = arith.constant 0.000000e+00 : f32
    %3 = vector.broadcast %cst : f32 to vector<4x128xf32>
    %4 = vector.extract_strided_slice %2 {offsets = [0, 0], sizes = [4, 128], strides = [1, 1]} : vector<12x128xf32> to vector<4x128xf32>
    %5 = vector.extract_strided_slice %2 {offsets = [4, 0], sizes = [4, 128], strides = [1, 1]} : vector<12x128xf32> to vector<4x128xf32>
    %6 = vector.extract_strided_slice %2 {offsets = [8, 0], sizes = [4, 128], strides = [1, 1]} : vector<12x128xf32> to vector<4x128xf32>
    %7 = tpu.concatenate %4, %3, %5, %3, %6, %3 in 0 : vector<4x128xf32>, vector<4x128xf32>, vector<4x128xf32>, vector<4x128xf32>, vector<4x128xf32>, vector<4x128xf32> -> vector<24x128xf32>
    %c0_1 = arith.constant 0 : index
    %c0_2 = arith.constant 0 : index
    %c0_3 = arith.constant 0 : index
    %8 = vector.load %arg2[%c0_1, %c0_2, %c0_3] : memref<2x48x24xf32, #tpu.memory_space<vmem>>, vector<1x48x24xf32>
    %9 = vector.shape_cast %8 : vector<1x48x24xf32> to vector<48x24xf32>
    %c0_4 = arith.constant 0 : index
    %c0_5 = arith.constant 0 : index
    %c0_6 = arith.constant 0 : index
    %10 = vector.load %arg3[%c0_4, %c0_5, %c0_6] : memref<2x16x16xf32, #tpu.memory_space<vmem>>, vector<1x16x16xf32>
    %11 = vector.shape_cast %10 : vector<1x16x16xf32> to vector<16x16xf32>
    %c0_7 = arith.constant 0 : index
    %c0_8 = arith.constant 0 : index
    %c0_9 = arith.constant 0 : index
    %12 = vector.load %arg4[%c0_7, %c0_8, %c0_9] : memref<2x16x1xf32, #tpu.memory_space<vmem>>, vector<1x16x1xf32>
    %13 = vector.shape_cast %12 : vector<1x16x1xf32> to vector<16x1xf32>
    %cst_10 = arith.constant dense<0.000000e+00> : vector<48x128xf32>
    %14 = tpu.matmul %9, %7, %cst_10 {dimension_numbers = #tpu.dot_dimension_numbers<[1], [0], [0], [1], [0, 0, 1, 1], [], []>, precision = #tpu.contract_precision<fp32>} : vector<48x24xf32>, vector<24x128xf32>, vector<48x128xf32> -> vector<48x128xf32>
    %15 = vector.extract_strided_slice %14 {offsets = [0, 0], sizes = [24, 128], strides = [1, 1]} : vector<48x128xf32> to vector<24x128xf32>
    %16 = vector.extract_strided_slice %14 {offsets = [24, 0], sizes = [24, 128], strides = [1, 1]} : vector<48x128xf32> to vector<24x128xf32>
    %17 = vector.extract_strided_slice %16 {offsets = [0, 0], sizes = [8, 128], strides = [1, 1]} : vector<24x128xf32> to vector<8x128xf32>
    %18 = vector.extract_strided_slice %16 {offsets = [0, 0], sizes = [8, 128], strides = [1, 1]} : vector<24x128xf32> to vector<8x128xf32>
    %19 = arith.mulf %17, %18 : vector<8x128xf32>
    %20 = vector.extract_strided_slice %16 {offsets = [8, 0], sizes = [8, 128], strides = [1, 1]} : vector<24x128xf32> to vector<8x128xf32>
    %21 = vector.extract_strided_slice %16 {offsets = [8, 0], sizes = [8, 128], strides = [1, 1]} : vector<24x128xf32> to vector<8x128xf32>
    %22 = arith.mulf %20, %21 : vector<8x128xf32>
    %23 = arith.addf %19, %22 : vector<8x128xf32>
    %24 = vector.extract_strided_slice %16 {offsets = [16, 0], sizes = [8, 128], strides = [1, 1]} : vector<24x128xf32> to vector<8x128xf32>
    %25 = vector.extract_strided_slice %16 {offsets = [16, 0], sizes = [8, 128], strides = [1, 1]} : vector<24x128xf32> to vector<8x128xf32>
    %26 = arith.mulf %24, %25 : vector<8x128xf32>
    %27 = arith.addf %23, %26 : vector<8x128xf32>
    %28 = math.sqrt %27 : vector<8x128xf32>
    %29 = tpu.concatenate %1, %28 in 0 : vector<8x128xf32>, vector<8x128xf32> -> vector<16x128xf32>
    %cst_11 = arith.constant dense<0.000000e+00> : vector<16x128xf32>
    %30 = tpu.matmul %11, %29, %cst_11 {dimension_numbers = #tpu.dot_dimension_numbers<[1], [0], [0], [1], [0, 0, 1, 1], [], []>, precision = #tpu.contract_precision<fp32>} : vector<16x16xf32>, vector<16x128xf32>, vector<16x128xf32> -> vector<16x128xf32>
    %31 = vector.broadcast %13 : vector<16x1xf32> to vector<16x128xf32>
    %32 = arith.addf %30, %31 : vector<16x128xf32>
    %33 = vector.extract_strided_slice %32 {offsets = [0, 0], sizes = [8, 128], strides = [1, 1]} : vector<16x128xf32> to vector<8x128xf32>
    %cst_12 = arith.constant 0.000000e+00 : f32
    %34 = vector.broadcast %cst_12 : f32 to vector<8x128xf32>
    %35 = arith.maximumf %33, %34 : vector<8x128xf32>
    %36 = vector.extract_strided_slice %32 {offsets = [8, 0], sizes = [8, 128], strides = [1, 1]} : vector<16x128xf32> to vector<8x128xf32>
    %37 = arith.negf %36 : vector<8x128xf32>
    %38 = math.exp %37 : vector<8x128xf32>
    %cst_13 = arith.constant 1.000000e+00 : f32
    %39 = vector.broadcast %cst_13 : f32 to vector<8x128xf32>
    %40 = arith.addf %39, %38 : vector<8x128xf32>
    %41 = arith.divf %39, %40 : vector<8x128xf32>
    %42 = tpu.concatenate %41, %41, %41 in 0 : vector<8x128xf32>, vector<8x128xf32>, vector<8x128xf32> -> vector<24x128xf32>
    %43 = arith.mulf %42, %15 : vector<24x128xf32>
    %c1 = arith.constant 1 : index
    %c0_14 = arith.constant 0 : index
    %c0_15 = arith.constant 0 : index
    %44 = vector.load %arg2[%c1, %c0_14, %c0_15] : memref<2x48x24xf32, #tpu.memory_space<vmem>>, vector<1x48x24xf32>
    %45 = vector.shape_cast %44 : vector<1x48x24xf32> to vector<48x24xf32>
    %c1_16 = arith.constant 1 : index
    %c0_17 = arith.constant 0 : index
    %c0_18 = arith.constant 0 : index
    %46 = vector.load %arg3[%c1_16, %c0_17, %c0_18] : memref<2x16x16xf32, #tpu.memory_space<vmem>>, vector<1x16x16xf32>
    %47 = vector.shape_cast %46 : vector<1x16x16xf32> to vector<16x16xf32>
    %c1_19 = arith.constant 1 : index
    %c0_20 = arith.constant 0 : index
    %c0_21 = arith.constant 0 : index
    %48 = vector.load %arg4[%c1_19, %c0_20, %c0_21] : memref<2x16x1xf32, #tpu.memory_space<vmem>>, vector<1x16x1xf32>
    %49 = vector.shape_cast %48 : vector<1x16x1xf32> to vector<16x1xf32>
    %cst_22 = arith.constant dense<0.000000e+00> : vector<48x128xf32>
    %50 = tpu.matmul %45, %43, %cst_22 {dimension_numbers = #tpu.dot_dimension_numbers<[1], [0], [0], [1], [0, 0, 1, 1], [], []>, precision = #tpu.contract_precision<fp32>} : vector<48x24xf32>, vector<24x128xf32>, vector<48x128xf32> -> vector<48x128xf32>
    %51 = vector.extract_strided_slice %50 {offsets = [0, 0], sizes = [24, 128], strides = [1, 1]} : vector<48x128xf32> to vector<24x128xf32>
    %52 = vector.extract_strided_slice %50 {offsets = [24, 0], sizes = [24, 128], strides = [1, 1]} : vector<48x128xf32> to vector<24x128xf32>
    %53 = vector.extract_strided_slice %52 {offsets = [0, 0], sizes = [8, 128], strides = [1, 1]} : vector<24x128xf32> to vector<8x128xf32>
    %54 = vector.extract_strided_slice %52 {offsets = [0, 0], sizes = [8, 128], strides = [1, 1]} : vector<24x128xf32> to vector<8x128xf32>
    %55 = arith.mulf %53, %54 : vector<8x128xf32>
    %56 = vector.extract_strided_slice %52 {offsets = [8, 0], sizes = [8, 128], strides = [1, 1]} : vector<24x128xf32> to vector<8x128xf32>
    %57 = vector.extract_strided_slice %52 {offsets = [8, 0], sizes = [8, 128], strides = [1, 1]} : vector<24x128xf32> to vector<8x128xf32>
    %58 = arith.mulf %56, %57 : vector<8x128xf32>
    %59 = arith.addf %55, %58 : vector<8x128xf32>
    %60 = vector.extract_strided_slice %52 {offsets = [16, 0], sizes = [8, 128], strides = [1, 1]} : vector<24x128xf32> to vector<8x128xf32>
    %61 = vector.extract_strided_slice %52 {offsets = [16, 0], sizes = [8, 128], strides = [1, 1]} : vector<24x128xf32> to vector<8x128xf32>
    %62 = arith.mulf %60, %61 : vector<8x128xf32>
    %63 = arith.addf %59, %62 : vector<8x128xf32>
    %64 = math.sqrt %63 : vector<8x128xf32>
    %65 = tpu.concatenate %35, %64 in 0 : vector<8x128xf32>, vector<8x128xf32> -> vector<16x128xf32>
    %cst_23 = arith.constant dense<0.000000e+00> : vector<16x128xf32>
    %66 = tpu.matmul %47, %65, %cst_23 {dimension_numbers = #tpu.dot_dimension_numbers<[1], [0], [0], [1], [0, 0, 1, 1], [], []>, precision = #tpu.contract_precision<fp32>} : vector<16x16xf32>, vector<16x128xf32>, vector<16x128xf32> -> vector<16x128xf32>
    %67 = vector.broadcast %49 : vector<16x1xf32> to vector<16x128xf32>
    %68 = arith.addf %66, %67 : vector<16x128xf32>
    %69 = vector.extract_strided_slice %68 {offsets = [0, 0], sizes = [8, 128], strides = [1, 1]} : vector<16x128xf32> to vector<8x128xf32>
    %cst_24 = arith.constant 0.000000e+00 : f32
    %70 = vector.broadcast %cst_24 : f32 to vector<8x128xf32>
    %71 = arith.maximumf %69, %70 : vector<8x128xf32>
    %72 = vector.extract_strided_slice %68 {offsets = [8, 0], sizes = [8, 128], strides = [1, 1]} : vector<16x128xf32> to vector<8x128xf32>
    %73 = arith.negf %72 : vector<8x128xf32>
    %74 = math.exp %73 : vector<8x128xf32>
    %cst_25 = arith.constant 1.000000e+00 : f32
    %75 = vector.broadcast %cst_25 : f32 to vector<8x128xf32>
    %76 = arith.addf %75, %74 : vector<8x128xf32>
    %77 = arith.divf %75, %76 : vector<8x128xf32>
    %78 = tpu.concatenate %77, %77, %77 in 0 : vector<8x128xf32>, vector<8x128xf32>, vector<8x128xf32> -> vector<24x128xf32>
    %79 = arith.mulf %78, %51 : vector<24x128xf32>
    %80 = vector.extract_strided_slice %79 {offsets = [0, 0], sizes = [4, 128], strides = [1, 1]} : vector<24x128xf32> to vector<4x128xf32>
    %81 = vector.extract_strided_slice %79 {offsets = [8, 0], sizes = [4, 128], strides = [1, 1]} : vector<24x128xf32> to vector<4x128xf32>
    %82 = vector.extract_strided_slice %79 {offsets = [16, 0], sizes = [4, 128], strides = [1, 1]} : vector<24x128xf32> to vector<4x128xf32>
    %83 = tpu.concatenate %80, %81, %82 in 0 : vector<4x128xf32>, vector<4x128xf32>, vector<4x128xf32> -> vector<12x128xf32>
    %84 = tpu.concatenate %71, %83 in 0 : vector<8x128xf32>, vector<12x128xf32> -> vector<20x128xf32>
    %c0_26 = arith.constant 0 : index
    %c0_27 = arith.constant 0 : index
    %85 = vector.load %arg5[%c0_26, %c0_27] : memref<20x128xf32, #tpu.memory_space<vmem>>, vector<20x128xf32>
    tpu.vector_store %arg5[%c0_26, %c0_27], %84 {strides = array<i32>} : memref<20x128xf32, #tpu.memory_space<vmem>>, vector<20x128xf32>,
    return
  }
  func.func @transform_0(%arg0: i32) -> (i32, i32) {
    %c0_i32 = arith.constant 0 : i32
    %c0_i32_0 = arith.constant 0 : i32
    return %c0_i32, %arg0 : i32, i32
  }
  func.func @transform_1(%arg0: i32) -> (i32, i32, i32) {
    %c0_i32 = arith.constant 0 : i32
    %c0_i32_0 = arith.constant 0 : i32
    %c0_i32_1 = arith.constant 0 : i32
    %c0_i32_2 = arith.constant 0 : i32
    return %c0_i32, %c0_i32_0, %c0_i32_1 : i32, i32, i32
  }
  func.func @transform_2(%arg0: i32) -> (i32, i32, i32) {
    %c0_i32 = arith.constant 0 : i32
    %c0_i32_0 = arith.constant 0 : i32
    %c0_i32_1 = arith.constant 0 : i32
    %c0_i32_2 = arith.constant 0 : i32
    return %c0_i32, %c0_i32_0, %c0_i32_1 : i32, i32, i32
  }
  func.func @transform_3(%arg0: i32) -> (i32, i32, i32) {
    %c0_i32 = arith.constant 0 : i32
    %c0_i32_0 = arith.constant 0 : i32
    %c0_i32_1 = arith.constant 0 : i32
    %c0_i32_2 = arith.constant 0 : i32
    return %c0_i32, %c0_i32_0, %c0_i32_1 : i32, i32, i32
  }
  func.func @transform_4(%arg0: i32) -> (i32, i32) {
    %c0_i32 = arith.constant 0 : i32
    %c0_i32_0 = arith.constant 0 : i32
    return %c0_i32, %arg0 : i32, i32
  }
}

</mosaic_0001>

<bundles_post_ra>
// kernel: tpu_custom_call.1
= control target key start
LH: loop header
LB: loop body
LE: loop exit
PB: predicated region body
PF: predicated region fallthrough
CT: control target
= control target key end

     0   :  { %vm24_vm0 = vcmask 1043456   ;;  %vm38_vm1 = vcmask 195584   ;;  %s1494_s0 = inlined_call_operand.vmem [shape: f32[20,128], index: 0, kind: input, shape index: {}]   ;;  %s1495_s1 = inlined_call_operand.vmem [shape: f32[2,48,24], index: 1, kind: input, shape index: {}]   ;;  %s1496_s2 = inlined_call_operand.vmem [shape: f32[2,16,16], index: 2, kind: input, shape index: {}]   ;;  %s1497_s3 = inlined_call_operand.vmem [shape: f32[2,16,1], index: 3, kind: input, shape index: {}]   ;;  %s1498_s4 = inlined_call_operand.hbm [shape: f32[20,128], index: 4, kind: output, shape index: {}]  }
   0x1   :  { %v20_v0 = vld [vmem:[%s1494_s0 + $0x10] sm:$0xf]  ;;  %v19_v1 = vld [vmem:[%s1494_s0 + $0x8] sm:$0xff]  ;;  %v28_v2 = vld [vmem:[%s1495_s1] sm:$0xff] }
   0x2   :  { %v27_v3 = vsel %vm24_vm0, %v20_v0, 0.0  ;;  %v22_v4 = vrot.slane %v19_v1, 4  ;;  %v25_v5 = vsel %vm24_vm0, %v19_v1, 0.0  ;;  %v40_v6 = vsel %vm38_vm1, %v28_v2, 0  ;;  %v29_v7 = vld [vmem:[%s1495_s1 + $0x8] sm:$0xff]  ;;  %v30_v8 = vld [vmem:[%s1495_s1 + $0x10] sm:$0xff] }
   0x3   :  { %v70_v9 = vand.u32 4294901760, %v27_v3  ;;  %v74_v10 = vand.u32 4294901760, %v25_v5  ;;  %v1363_v11 = vand.u32 4294901760, %v40_v6  ;;  %v43_v12 = vsel %vm38_vm1, %v29_v7, 0 }
   0x4   :  { %v26_v13 = vsel %vm24_vm0, %v22_v4, 0.0  ;;  %v1367_v14 = vand.u32 4294901760, %v43_v12  ;;  %v46_v15 = vsel %vm38_vm1, %v30_v8, 0 }
   0x5   :  { %9 = vsyncpa [#allocation3], 0  ;;  %71 = vmatpush.msra.mxu0 %v70_v9  ;;  %v139_v16 = vsub.f32 %v27_v3, %v70_v9  ;;  %v72_v17 = vand.u32 4294901760, %v26_v13  ;;  %248 = vmatpush.msra.mxu3 %v70_v9  ;;  %v77_v18 = vsub.f32 %v40_v6, %v1363_v11  ;;  %v151_v19 = vsub.f32 %v25_v5, %v74_v10  ;;  %v31_v34 = vld [vmem:[%s1495_s1 + $0x18] sm:$0xff]  ;;  %v32_v43 = vld [vmem:[%s1495_s1 + $0x20] sm:$0xff]  ;;  %s1248_s9 = sshll.u32 %s1498_s4, 4  ;;  %s1249_s9 = int_to_ptr.hbm [resolvable:$true] %s1248_s9 }
   0x6   :  { %v85_v20 = vsub.f32 %v43_v12, %v1367_v14  ;;  %v1372_v26 = vand.u32 4294901760, %v46_v15  ;;  %v49_v39 = vsel %vm38_vm1, %v31_v34, 0  ;;  %v52_v46 = vsel %vm38_vm1, %v32_v43, 0  ;;  %v33_v50 = vld [vmem:[%s1495_s1 + $0x28] sm:$0xff]  ;;  %s1318_s10 = smov 128   ;;  %s1319_s11 = smov 8  }
   0x7   :  { %196 = vmatpush.msra.mxu2 %v139_v16  ;;  %73 = vmatpush.msra.mxu0 %v72_v17  ;;  %v145_v21 = vsub.f32 %v26_v13, %v72_v17  ;;  %v78_v22 = vand.u32 4294901760, %v77_v18  ;;  %v140_v23 = vand.u32 4294901760, %v139_v16  ;;  %v152_v24 = vand.u32 4294901760, %v151_v19 }
   0x8   :  { %250 = vmatpush.msra.mxu3 %v72_v17  ;;  %v86_v25 = vand.u32 4294901760, %v85_v20  ;;  %v93_v38 = vsub.f32 %v46_v15, %v1372_v26  ;;  %v100_v42 = vand.u32 4294901760, %v49_v39  ;;  %v108_v49 = vand.u32 4294901760, %v52_v46 }
   0x9   :  { %199 = vmatpush.msra.mxu2 %v145_v21  ;;  %75 = vmatpush.msra.mxu0 %v74_v10  ;;  %v79_v27 = vsub.f32 %v77_v18, %v78_v22  ;;  %v141_v28 = vsub.f32 %v139_v16, %v140_v23  ;;  %v146_v29 = vand.u32 4294901760, %v145_v21  ;;  %v153_v30 = vsub.f32 %v151_v19, %v152_v24 }
   0xa   :  { %252 = vmatpush.msra.mxu3 %v74_v10  ;;  %v87_v37 = vsub.f32 %v85_v20, %v86_v25  ;;  %v94_v41 = vand.u32 4294901760, %v93_v38  ;;  %v101_v45 = vsub.f32 %v49_v39, %v100_v42  ;;  %v109_v52 = vsub.f32 %v52_v46, %v108_v49 }
   0xb   :  { %306 = vmatpush.msrb.mxu0 %v140_v23  ;;  %v80_v31 = vand.u32 4294901760, %v79_v27  ;;  %v142_v32 = vand.u32 4294901760, %v141_v28  ;;  %202 = vmatpush.msra.mxu2 %v151_v19  ;;  %v147_v33 = vsub.f32 %v145_v21, %v146_v29  ;;  %v154_v36 = vand.u32 4294901760, %v153_v30 }
   0xc   :  { %256 = vmatmul.f32.vlgmr.msra.gmra.mxu3 %v78_v22  ;;  %205 = vmatmul.f32.vlgmr.msra.gmra.mxu2 %v77_v18  ;;  %v88_v40 = vand.u32 4294901760, %v87_v37  ;;  %v95_v44 = vsub.f32 %v93_v38, %v94_v41  ;;  %v102_v48 = vand.u32 4294901760, %v101_v45  ;;  %v55_v53 = vsel %vm38_vm1, %v33_v50, 0 }
   0xd   :  { %310 = vmatpush.msrb.mxu0 %v146_v29  ;;  %143 = vmatpush.msra.mxu1 %v142_v32  ;;  %v148_v35 = vand.u32 4294901760, %v147_v33  ;;  %v110_v55 = vand.u32 4294901760, %v109_v52  ;;  %v116_v56 = vand.u32 4294901760, %v55_v53  ;;  %vm411_vm2 = vcmask 130048  }
   0xe   :  { %81 = vmatmul.f32.vlgmr.msra.gmra.mxu0 %v80_v31  ;;  %v96_v47 = vand.u32 4294901760, %v95_v44  ;;  %v103_v51 = vsub.f32 %v101_v45, %v102_v48 }
   0xf   :  { %314 = vmatpush.msrb.mxu0 %v152_v24  ;;  %149 = vmatpush.msra.mxu1 %v148_v35  ;;  %v111_v57 = vsub.f32 %v109_v52, %v110_v55  ;;  %v117_v58 = vsub.f32 %v55_v53, %v116_v56 }
  0x10   :  { %v104_v54 = vand.u32 4294901760, %v103_v51 }
  0x11   :  { %155 = vmatpush.msra.mxu1 %v154_v36  ;;  %v112_v59 = vand.u32 4294901760, %v111_v57  ;;  %v118_v60 = vand.u32 4294901760, %v117_v58 }
  0x12   :  { %157 = vmatmul.f32.vlgmr.msra.gmra.mxu1 %v1363_v11 }
  0x13   :  { %354 = vmatpush.msrb.mxu1 %v70_v9  ;;  %v119_v61 = vsub.f32 %v117_v58, %v118_v60 }
  0x14   :  { %262 = vmatmul.f32.gmra.mxu3 %v86_v25  ;;  %210 = vmatmul.f32.gmra.mxu2 %v85_v20 }
  0x15   :  { %356 = vmatpush.msrb.mxu1 %v72_v17  ;;  %v120_v62 = vand.u32 4294901760, %v119_v61 }
  0x16   :  { %89 = vmatmul.f32.gmra.mxu0 %v88_v40 }
  0x17   :  { %358 = vmatpush.msrb.mxu1 %v74_v10 }
  0x1a   :  { %161 = vmatmul.f32.gmra.mxu1 %v1367_v14 }
  0x1c   :  { %268 = vmatmul.f32.gmra.mxu3 %v94_v41  ;;  %215 = vmatmul.f32.gmra.mxu2 %v93_v38 }
  0x1e   :  { %97 = vmatmul.f32.gmra.mxu0 %v96_v47 }
  0x22   :  { %165 = vmatmul.f32.gmra.mxu1 %v1372_v26 }
  0x24   :  { %274 = vmatmul.f32.gmra.mxu3 %v102_v48  ;;  %220 = vmatmul.f32.gmra.mxu2 %v101_v45 }
  0x26   :  { %105 = vmatmul.f32.gmra.mxu0 %v104_v54 }
  0x2a   :  { %169 = vmatmul.f32.gmra.mxu1 %v100_v42 }
  0x2c   :  { %280 = vmatmul.f32.gmra.mxu3 %v110_v55  ;;  %225 = vmatmul.f32.gmra.mxu2 %v109_v52 }
  0x2e   :  { %113 = vmatmul.f32.gmra.mxu0 %v112_v59 }
  0x32   :  { %173 = vmatmul.f32.gmra.mxu1 %v108_v49 }
  0x34   :  { %286 = vmatmul.f32.gmra.mxu3 %v118_v60  ;;  %230 = vmatmul.f32.gmra.mxu2 %v117_v58 }
  0x36   :  { %121 = vmatmul.f32.gmra.mxu0 %v120_v62 }
  0x3a   :  { %177 = vmatmul.f32.gmra.mxu1 %v116_v56 }
  0x3e   :  { %316 = vmatmul.f32.vlgmr.msrb.gmra.mxu0 %v1363_v11 }
  0x42   :  { %360 = vmatmul.f32.vlgmr.msrb.gmra.mxu1 %v1363_v11 }
  0x46   :  { %320 = vmatmul.f32.gmra.mxu0 %v1367_v14 }
  0x4a   :  { %364 = vmatmul.f32.gmra.mxu1 %v1367_v14 }
  0x4e   :  { %324 = vmatmul.f32.gmra.mxu0 %v1372_v26 }
  0x52   :  { %368 = vmatmul.f32.gmra.mxu1 %v1372_v26 }
  0x56   :  { %328 = vmatmul.f32.gmra.mxu0 %v100_v42 }
  0x5a   :  { %372 = vmatmul.f32.gmra.mxu1 %v100_v42 }
  0x5e   :  { %332 = vmatmul.f32.gmra.mxu0 %v108_v49 }
  0x62   :  { %376 = vmatmul.f32.gmra.mxu1 %v108_v49 }
  0x66   :  { %336 = vmatmul.f32.gmra.mxu0 %v116_v56 }
  0x6a   :  { %380 = vmatmul.f32.gmra.mxu1 %v116_v56 }
  0x8b   :  { %v82_v63 = vpop.f32.mrf.mxu0 }
  0x8f   :  { %v257_v0 = vpop.f32.mrf.mxu3  ;;  %v158_v1 = vpop.f32.mrf.mxu1 }
  0x90   :  { %v206_v2 = vpop.f32.mrf.mxu2  ;;  %v159_v3 = vadd.f32 %v158_v1, %v82_v63 }
  0x92   :  { %v207_v4 = vadd.f32 %v206_v2, %v159_v3 }
  0x93   :  { %v90_v5 = vpop.f32.mrf.mxu0 }
  0x94   :  { %v258_v6 = vadd.f32 %v257_v0, %v207_v4 }
  0x97   :  { %v263_v7 = vpop.f32.mrf.mxu3  ;;  %v162_v8 = vpop.f32.mrf.mxu1 }
  0x98   :  { %v211_v9 = vpop.f32.mrf.mxu2  ;;  %v163_v10 = vadd.f32 %v162_v8, %v90_v5 }
  0x9a   :  { %v212_v11 = vadd.f32 %v211_v9, %v163_v10  ;;  %v37_v10 = vld [vmem:[%s1497_s3 + $0x8] sm:$0xff] }
  0x9b   :  { %v98_v12 = vpop.f32.mrf.mxu0 }
  0x9c   :  { %v264_v13 = vadd.f32 %v263_v7, %v212_v11 }
  0x9f   :  { %v166_v14 = vpop.f32.mrf.mxu1  ;;  %v269_v17 = vpop.f32.mrf.mxu3 }
  0xa0   :  { %v216_v15 = vpop.f32.mrf.mxu2  ;;  %v167_v16 = vadd.f32 %v166_v14, %v98_v12  ;;  %v1316_v12 = vmov 0  }
  0xa1   :  { %1276 = vset.pattern.permute.xlu0 %v1316_v12  ;;  %1277 = vset.pattern.permute.xlu1 %v1316_v12  ;;  %v1261_v12 = vld [vmem:[%s1495_s1 + $0x30] sm:$0xff] }
  0xa2   :  { %v217_v18 = vadd.f32 %v216_v15, %v167_v16  ;;  %408 = vperm.xlu0 %1276, %v37_v10   ;;  %v18_v15 = vld [vmem:[%s1494_s0] sm:$0xff] }
  0xa3   :  { %v106_v19 = vpop.f32.mrf.mxu0 }
  0xa4   :  { %v270_v20 = vadd.f32 %v269_v17, %v217_v18 }
  0xa7   :  { %v170_v21 = vpop.f32.mrf.mxu1  ;;  %v275_v37 = vpop.f32.mrf.mxu3 }
  0xa8   :  { %v221_v34 = vpop.f32.mrf.mxu2  ;;  %v171_v45 = vadd.f32 %v170_v21, %v106_v19  ;;  %v36_v21 = vld [vmem:[%s1497_s3] sm:$0xff] }
  0xaa   :  { %v222_v48 = vadd.f32 %v221_v34, %v171_v45  ;;  %403 = vperm.xlu0 %1276, %v36_v21  }
  0xab   :  { %v114_v22 = vpop.f32.mrf.mxu0 }
  0xac   :  { %v276_v53 = vadd.f32 %v275_v37, %v222_v48 }
  0xaf   :  { %v174_v23 = vpop.f32.mrf.mxu1  ;;  %v281_v43 = vpop.f32.mrf.mxu3 }
  0xb0   :  { %v226_v41 = vpop.f32.mrf.mxu2  ;;  %v175_v42 = vadd.f32 %v174_v23, %v114_v22 }
  0xb2   :  { %v227_v46 = vadd.f32 %v226_v41, %v175_v42 }
  0xb3   :  { %v122_v24 = vpop.f32.mrf.mxu0 }
  0xb4   :  { %v282_v51 = vadd.f32 %v281_v43, %v227_v46 }
  0xb7   :  { %v178_v25 = vpop.f32.mrf.mxu1  ;;  %v287_v56 = vpop.f32.mrf.mxu3 }
  0xb8   :  { %v179_v49 = vadd.f32 %v178_v25, %v122_v24  ;;  %v231_v50 = vpop.f32.mrf.mxu2 }
  0xba   :  { %v232_v54 = vadd.f32 %v231_v50, %v179_v49 }
  0xbb   :  { %v317_v26 = vpop.f32.mrf.mxu0 }
  0xbc   :  { %v318_v27 = vadd.f32 %v317_v26, %v258_v6  ;;  %v288_v60 = vadd.f32 %v287_v56, %v232_v54  ;;  %v34_v6 = vld [vmem:[%s1496_s2] sm:$0xff] }
  0xbd   :  { %v413_v7 = vsel %vm411_vm2, %v34_v6, 0 }
  0xbe   :  { %v436_v9 = vand.u32 4294901760, %v413_v7 }
  0xbf   :  { %v361_v28 = vpop.f32.mrf.mxu1 }
  0xc0   :  { %v1396_v29 = vadd.f32 %v361_v28, %v318_v27  ;;  %v437_v16 = vsub.f32 %v413_v7, %v436_v9 }
  0xc2   :  { %v438_v22 = vand.u32 4294901760, %v437_v16 }
  0xc3   :  { %v321_v30 = vpop.f32.mrf.mxu0 }
  0xc4   :  { %v322_v31 = vadd.f32 %v321_v30, %v264_v13  ;;  %v35_v13 = vld [vmem:[%s1496_s2 + $0x8] sm:$0xff]  ;;  %v439_v28 = vsub.f32 %v437_v16, %v438_v22 }
  0xc5   :  { %v416_v18 = vsel %vm411_vm2, %v35_v13, 0  ;;  %v645_v13 = vsel %vm38_vm1, %v1261_v12, 0 }
  0xc6   :  { %v444_v23 = vand.u32 4294901760, %v416_v18 }
  0xc7   :  { %v365_v32 = vpop.f32.mrf.mxu1 }
  0xc8   :  { %v1398_v33 = vadd.f32 %v365_v32, %v322_v31  ;;  %v445_v30 = vsub.f32 %v416_v18, %v444_v23 }
  0xca   :  { %v446_v37 = vand.u32 4294901760, %v445_v30 }
  0xcb   :  { %v325_v35 = vpop.f32.mrf.mxu0 }
  0xcc   :  { %v326_v36 = vadd.f32 %v325_v35, %v270_v20  ;;  %v434_v20 = vand.u32 4294901760, %v18_v15  ;;  %v447_v42 = vsub.f32 %v445_v30, %v446_v37 }
  0xce   :  { %v474_v26 = vsub.f32 %v18_v15, %v434_v20  ;;  %v448_v46 = vand.u32 4294901760, %v447_v42  ;;  %v1425_v15 = vand.u32 4294901760, %v645_v13 }
  0xcf   :  { %v369_v38 = vpop.f32.mrf.mxu1 }
  0xd0   :  { %v1400_v39 = vadd.f32 %v369_v38, %v326_v36  ;;  %v475_v35 = vand.u32 4294901760, %v474_v26  ;;  %v440_v36 = vand.u32 4294901760, %v439_v28 }
  0xd2   :  { %v476_v41 = vsub.f32 %v474_v26, %v475_v35 }
  0xd3   :  { %v329_v40 = vpop.f32.mrf.mxu0 }
  0xd4   :  { %v330_v57 = vadd.f32 %v329_v40, %v276_v53  ;;  %v477_v45 = vand.u32 4294901760, %v476_v41 }
  0xd7   :  { %v373_v44 = vpop.f32.mrf.mxu1 }
  0xd8   :  { %v374_v61 = vadd.f32 %v373_v44, %v330_v57 }
  0xda   :  { %v384_v1 = vmul.f32 %v374_v61, %v374_v61 }
  0xdb   :  { %v333_v47 = vpop.f32.mrf.mxu0 }
  0xdc   :  { %v334_v55 = vadd.f32 %v333_v47, %v282_v51 }
  0xdf   :  { %v377_v52 = vpop.f32.mrf.mxu1 }
  0xe0   :  { %v378_v58 = vadd.f32 %v377_v52, %v334_v55 }
  0xe2   :  { %v385_v62 = vmul.f32 %v378_v58, %v378_v58 }
  0xe3   :  { %v337_v59 = vpop.f32.mrf.mxu0 }
  0xe4   :  { %v338_v63 = vadd.f32 %v337_v59, %v288_v60  ;;  %v386_v3 = vadd.f32 %v385_v62, %v384_v1 }
  0xe7   :  { %v381_v0 = vpop.f32.mrf.mxu1 }
  0xe8   :  { %v382_v2 = vadd.f32 %v381_v0, %v338_v63 }
  0xea   :  { %v387_v4 = vmul.f32 %v382_v2, %v382_v2 }
  0xec   :  { %v388_v5 = vadd.f32 %v387_v4, %v386_v3 }
  0xee   :  { %1278 = vrsqrt.f32 %v388_v5  ;;  %vm396_vm3 = vcmp.eq.f32.partialorder %v388_v5, inf  ;;  %v399_v27 = vand.u32 2147483648, %v388_v5  ;;  %vm398_vm4 = vcmp.eq.f32.partialorder %v388_v5, 0.0 }
  0xf4   :  { %v1279_v8 = vpop.eup %1278 }
  0xf5   :  { %v390_v11 = vmul.f32 %v1279_v8, %v388_v5 }
  0xf7   :  { %v391_v14 = vmul.f32 %v1279_v8, %v390_v11 }
  0xf9   :  { %v392_v17 = vmul.f32 0.5, %v391_v14 }
  0xfb   :  { %v393_v19 = vsub.f32 1.5, %v392_v17  ;;  %v1262_v17 = vld [vmem:[%s1495_s1 + $0x38] sm:$0xff] }
  0xfd   :  { %v394_v24 = vmul.f32 %v1279_v8, %v393_v19 }
  0xff   :  { %v395_v25 = vmul.f32 %v394_v24, %v388_v5 }
 0x101   :  { %v397_v31 = vsel %vm396_vm3, %v388_v5, %v395_v25 }
 0x102   :  { %v400_v32 = vsel %vm398_vm4, %v399_v27, %v397_v31  ;;  %v1263_v31 = vld [vmem:[%s1495_s1 + $0x40] sm:$0xff] }
 0x103   :  { %v432_v34 = vand.u32 4294901760, %v400_v32  ;;  %v651_v42 = vsel %vm38_vm1, %v1263_v31, 0 }
 0x105   :  { %433 = vmatpush.msrb.mxu2 %v432_v34  ;;  %v468_v38 = vsub.f32 %v400_v32, %v432_v34 }
 0x107   :  { %435 = vmatpush.msrb.mxu2 %v434_v20  ;;  %v469_v40 = vand.u32 4294901760, %v468_v38 }
 0x108   :  { %441 = vmatmul.f32.vlgmr.msrb.gmra.mxu2 %v440_v36 }
 0x109   :  { %504 = vmatpush.msra.mxu2 %v468_v38  ;;  %v470_v43 = vsub.f32 %v468_v38, %v469_v40 }
 0x10b   :  { %507 = vmatpush.msra.mxu2 %v474_v26  ;;  %v471_v44 = vand.u32 4294901760, %v470_v43 }
 0x10d   :  { %567 = vmatpush.msrb.mxu2 %v469_v40  ;;  %472 = vmatpush.msrb.mxu3 %v471_v44 }
 0x10f   :  { %571 = vmatpush.msrb.mxu2 %v475_v35  ;;  %478 = vmatpush.msrb.mxu3 %v477_v45 }
 0x110   :  { %449 = vmatmul.f32.gmra.mxu2 %v448_v46  ;;  %480 = vmatmul.f32.vlgmr.msrb.gmra.mxu3 %v436_v9 }
 0x111   :  { %534 = vmatpush.msra.mxu3 %v432_v34 }
 0x113   :  { %536 = vmatpush.msra.mxu3 %v434_v20 }
 0x114   :  { %v409_v47 = vpop.permute.xlu0 %408 }
 0x115   :  { %596 = vmatpush.msrb.mxu3 %v432_v34 }
 0x117   :  { %598 = vmatpush.msrb.mxu3 %v434_v20  ;;  %v682_v20 = vsub.f32 %v645_v13, %v1425_v15 }
 0x118   :  { %484 = vmatmul.f32.gmra.mxu3 %v444_v23  ;;  %510 = vmatmul.f32.vlgmr.msra.gmra.mxu2 %v437_v16 }
 0x119   :  { %v683_v26 = vand.u32 4294901760, %v682_v20 }
 0x11b   :  { %v684_v36 = vsub.f32 %v682_v20, %v683_v26 }
 0x11c   :  { %v404_v49 = vpop.permute.xlu0 %403 }
 0x11d   :  { %v685_v46 = vand.u32 4294901760, %v684_v36 }
 0x120   :  { %515 = vmatmul.f32.gmra.mxu2 %v445_v30  ;;  %540 = vmatmul.f32.vlgmr.msra.gmra.mxu3 %v438_v22 }
 0x128   :  { %546 = vmatmul.f32.gmra.mxu3 %v446_v37  ;;  %573 = vmatmul.f32.vlgmr.msrb.gmra.mxu2 %v436_v9 }
 0x130   :  { %577 = vmatmul.f32.gmra.mxu2 %v444_v23  ;;  %600 = vmatmul.f32.vlgmr.msrb.gmra.mxu3 %v436_v9 }
 0x138   :  { %604 = vmatmul.f32.gmra.mxu3 %v444_v23  ;;  %v648_v23 = vsel %vm38_vm1, %v1262_v17, 0 }
 0x139   :  { %v1432_v27 = vand.u32 4294901760, %v648_v23 }
 0x13b   :  { %v690_v37 = vsub.f32 %v648_v23, %v1432_v27 }
 0x18b   :  { %v442_v48 = vpop.f32.mrf.mxu2 }
 0x18c   :  { %v443_v50 = vadd.f32 %v442_v48, %v404_v49  ;;  %v1264_v49 = vld [vmem:[%s1495_s1 + $0x48] sm:$0xff] }
 0x193   :  { %v450_v51 = vpop.f32.mrf.mxu2  ;;  %v481_v52 = vpop.f32.mrf.mxu3 }
 0x194   :  { %v482_v53 = vadd.f32 %v481_v52, %v443_v50  ;;  %v451_v63 = vadd.f32 %v450_v51, %v409_v47  ;;  %v691_v47 = vand.u32 4294901760, %v690_v37 }
 0x196   :  { %v692_v52 = vsub.f32 %v690_v37, %v691_v47 }
 0x19b   :  { %v485_v54 = vpop.f32.mrf.mxu3  ;;  %v511_v55 = vpop.f32.mrf.mxu2 }
 0x19c   :  { %v512_v56 = vadd.f32 %v511_v55, %v482_v53  ;;  %v486_v1 = vadd.f32 %v485_v54, %v451_v63 }
 0x1a3   :  { %v516_v57 = vpop.f32.mrf.mxu2  ;;  %v541_v58 = vpop.f32.mrf.mxu3 }
 0x1a4   :  { %v542_v59 = vadd.f32 %v541_v58, %v512_v56  ;;  %v517_v3 = vadd.f32 %v516_v57, %v486_v1  ;;  %v654_v56 = vsel %vm38_vm1, %v1264_v49, 0  ;;  %v693_v58 = vand.u32 4294901760, %v692_v52 }
 0x1ab   :  { %v547_v60 = vpop.f32.mrf.mxu3  ;;  %v574_v61 = vpop.f32.mrf.mxu2 }
 0x1ac   :  { %v575_v62 = vadd.f32 %v574_v61, %v542_v59  ;;  %v548_v5 = vadd.f32 %v547_v60, %v517_v3  ;;  %v705_v60 = vand.u32 4294901760, %v654_v56 }
 0x1b3   :  { %v601_v0 = vpop.f32.mrf.mxu3  ;;  %v578_v4 = vpop.f32.mrf.mxu2 }
 0x1b4   :  { %v1419_v2 = vadd.f32 %v601_v0, %v575_v62  ;;  %v579_v6 = vadd.f32 %v578_v4, %v548_v5  ;;  %v1265_v62 = vld [vmem:[%s1495_s1 + $0x50] sm:$0xff]  ;;  %v706_v0 = vsub.f32 %v654_v56, %v705_v60 }
 0x1b5   :  { %v657_v1 = vsel %vm38_vm1, %v1265_v62, 0 }
 0x1b6   :  { %v707_v4 = vand.u32 4294901760, %v706_v0  ;;  %v713_v5 = vand.u32 4294901760, %v657_v1 }
 0x1bb   :  { %v605_v7 = vpop.f32.mrf.mxu3 }
 0x1bc   :  { %v606_v8 = vadd.f32 %v605_v7, %v579_v6  ;;  %v1266_v6 = vld [vmem:[%s1495_s1 + $0x58] sm:$0xff]  ;;  %v708_v7 = vsub.f32 %v706_v0, %v707_v4 }
 0x1be   :  { %v1260_v9 = vmul.f32 -1.442695, %v606_v8  ;;  %v714_v8 = vsub.f32 %v657_v1, %v713_v5 }
 0x1c0   :  { %1280 = vpow2.f32 %v1260_v9  ;;  %v660_v9 = vsel %vm38_vm1, %v1266_v6, 0 }
 0x1c1   :  { %v721_v12 = vand.u32 4294901760, %v660_v9 }
 0x1c6   :  { %v1281_v10 = vpop.eup %1280 }
 0x1c7   :  { %v612_v11 = vadd.f32 1.0, %v1281_v10  ;;  %v709_v10 = vand.u32 4294901760, %v708_v7 }
 0x1c9   :  { %1282 = vrcp.f32 %v612_v11  ;;  %v624_v19 = vand.u32 2147483648, %v612_v11  ;;  %v622_v22 = vand.u32 2147483647, %v612_v11  ;;  %vm618_vm6 = vweird.f32 %v612_v11 }
 0x1cb   :  { %v625_v25 = vor.u32 1.1754944e-38, %v624_v19  ;;  %vm623_vm8 = vcmp.eq.f32.partialorder %v622_v22, 8.507059e+37 }
 0x1cf   :  { %v1283_v14 = vpop.eup %1282 }
 0x1d0   :  { %v614_v16 = vmul.f32 %v1283_v14, %v612_v11  ;;  %vm619_vm5 = vweird.f32 %v1283_v14  ;;  %v715_v11 = vand.u32 4294901760, %v714_v8 }
 0x1d1   :  { %vm620_vm7 = vmor %vm618_vm6, %vm619_vm5 }
 0x1d2   :  { %v615_v18 = vsub.f32 1.0, %v614_v16  ;;  %v716_v13 = vsub.f32 %v714_v8, %v715_v11 }
 0x1d4   :  { %v616_v21 = vmul.f32 %v1283_v14, %v615_v18  ;;  %v717_v16 = vand.u32 4294901760, %v716_v13 }
 0x1d6   :  { %v617_v24 = vadd.f32 %v1283_v14, %v616_v21 }
 0x1d8   :  { %v621_v28 = vsel %vm620_vm7, %v1283_v14, %v617_v24  ;;  %v722_v14 = vsub.f32 %v660_v9, %v721_v12 }
 0x1d9   :  { %v626_v30 = vsel %vm623_vm8, %v625_v25, %v621_v28 }
 0x1da   :  { %v630_v32 = vmul.f32 %v626_v30, %v1400_v39  ;;  %v629_v34 = vmul.f32 %v626_v30, %v1398_v33  ;;  %v628_v35 = vmul.f32 %v626_v30, %v1396_v29  ;;  %v1442_v39 = vand.u32 4294901760, %v651_v42 }
 0x1db   :  { %v723_v17 = vand.u32 4294901760, %v722_v14 }
 0x1dc   :  { %v675_v38 = vand.u32 4294901760, %v630_v32  ;;  %v677_v40 = vand.u32 4294901760, %v629_v34  ;;  %v679_v41 = vand.u32 4294901760, %v628_v35  ;;  %v698_v53 = vsub.f32 %v651_v42, %v1442_v39 }
 0x1dd   :  { %v724_v18 = vsub.f32 %v722_v14, %v723_v17 }
 0x1de   :  { %676 = vmatpush.msra.mxu0 %v675_v38  ;;  %853 = vmatpush.msra.mxu3 %v675_v38  ;;  %v744_v43 = vsub.f32 %v630_v32, %v675_v38  ;;  %v750_v44 = vsub.f32 %v629_v34, %v677_v40  ;;  %v756_v45 = vsub.f32 %v628_v35, %v679_v41  ;;  %v699_v59 = vand.u32 4294901760, %v698_v53 }
 0x1df   :  { %v725_v19 = vand.u32 4294901760, %v724_v18 }
 0x1e0   :  { %678 = vmatpush.msra.mxu0 %v677_v40  ;;  %801 = vmatpush.msra.mxu2 %v744_v43  ;;  %v745_v29 = vand.u32 4294901760, %v744_v43  ;;  %v751_v33 = vand.u32 4294901760, %v750_v44  ;;  %v757_v48 = vand.u32 4294901760, %v756_v45  ;;  %v700_v63 = vsub.f32 %v698_v53, %v699_v59 }
 0x1e1   :  { %855 = vmatpush.msra.mxu3 %v677_v40 }
 0x1e2   :  { %680 = vmatpush.msra.mxu0 %v679_v41  ;;  %804 = vmatpush.msra.mxu2 %v750_v44  ;;  %v746_v50 = vsub.f32 %v744_v43, %v745_v29  ;;  %v752_v51 = vsub.f32 %v750_v44, %v751_v33  ;;  %v758_v55 = vsub.f32 %v756_v45, %v757_v48  ;;  %v701_v3 = vand.u32 4294901760, %v700_v63 }
 0x1e3   :  { %857 = vmatpush.msra.mxu3 %v679_v41  ;;  %686 = vmatmul.f32.vlgmr.msra.gmra.mxu0 %v685_v46 }
 0x1e4   :  { %911 = vmatpush.msrb.mxu0 %v745_v29  ;;  %807 = vmatpush.msra.mxu2 %v756_v45  ;;  %v747_v54 = vand.u32 4294901760, %v746_v50  ;;  %v753_v57 = vand.u32 4294901760, %v752_v51  ;;  %v759_v61 = vand.u32 4294901760, %v758_v55 }
 0x1e5   :  { %810 = vmatmul.f32.vlgmr.msra.gmra.mxu2 %v682_v20  ;;  %861 = vmatmul.f32.vlgmr.msra.gmra.mxu3 %v683_v26 }
 0x1e6   :  { %915 = vmatpush.msrb.mxu0 %v751_v33  ;;  %748 = vmatpush.msra.mxu1 %v747_v54 }
 0x1e8   :  { %919 = vmatpush.msrb.mxu0 %v757_v48  ;;  %754 = vmatpush.msra.mxu1 %v753_v57 }
 0x1ea   :  { %760 = vmatpush.msra.mxu1 %v759_v61 }
 0x1eb   :  { %694 = vmatmul.f32.gmra.mxu0 %v693_v58  ;;  %762 = vmatmul.f32.vlgmr.msra.gmra.mxu1 %v1425_v15 }
 0x1ec   :  { %959 = vmatpush.msrb.mxu1 %v675_v38 }
 0x1ed   :  { %815 = vmatmul.f32.gmra.mxu2 %v690_v37  ;;  %867 = vmatmul.f32.gmra.mxu3 %v691_v47 }
 0x1ee   :  { %961 = vmatpush.msrb.mxu1 %v677_v40 }
 0x1f0   :  { %963 = vmatpush.msrb.mxu1 %v679_v41 }
 0x1f3   :  { %702 = vmatmul.f32.gmra.mxu0 %v701_v3  ;;  %766 = vmatmul.f32.gmra.mxu1 %v1432_v27 }
 0x1f5   :  { %820 = vmatmul.f32.gmra.mxu2 %v698_v53  ;;  %873 = vmatmul.f32.gmra.mxu3 %v699_v59 }
 0x1fb   :  { %710 = vmatmul.f32.gmra.mxu0 %v709_v10  ;;  %770 = vmatmul.f32.gmra.mxu1 %v1442_v39 }
 0x1fd   :  { %825 = vmatmul.f32.gmra.mxu2 %v706_v0  ;;  %879 = vmatmul.f32.gmra.mxu3 %v707_v4 }
 0x203   :  { %718 = vmatmul.f32.gmra.mxu0 %v717_v16  ;;  %774 = vmatmul.f32.gmra.mxu1 %v705_v60 }
 0x205   :  { %830 = vmatmul.f32.gmra.mxu2 %v714_v8  ;;  %885 = vmatmul.f32.gmra.mxu3 %v715_v11 }
 0x20b   :  { %726 = vmatmul.f32.gmra.mxu0 %v725_v19  ;;  %778 = vmatmul.f32.gmra.mxu1 %v713_v5 }
 0x20d   :  { %835 = vmatmul.f32.gmra.mxu2 %v722_v14  ;;  %891 = vmatmul.f32.gmra.mxu3 %v723_v17 }
 0x213   :  { %782 = vmatmul.f32.gmra.mxu1 %v721_v12  ;;  %921 = vmatmul.f32.vlgmr.msrb.gmra.mxu0 %v1425_v15 }
 0x21b   :  { %925 = vmatmul.f32.gmra.mxu0 %v1432_v27  ;;  %965 = vmatmul.f32.vlgmr.msrb.gmra.mxu1 %v1425_v15 }
 0x223   :  { %929 = vmatmul.f32.gmra.mxu0 %v1442_v39  ;;  %969 = vmatmul.f32.gmra.mxu1 %v1432_v27 }
 0x22b   :  { %933 = vmatmul.f32.gmra.mxu0 %v705_v60  ;;  %973 = vmatmul.f32.gmra.mxu1 %v1442_v39 }
 0x233   :  { %937 = vmatmul.f32.gmra.mxu0 %v713_v5  ;;  %977 = vmatmul.f32.gmra.mxu1 %v705_v60 }
 0x23b   :  { %941 = vmatmul.f32.gmra.mxu0 %v721_v12  ;;  %981 = vmatmul.f32.gmra.mxu1 %v713_v5 }
 0x243   :  { %985 = vmatmul.f32.gmra.mxu1 %v721_v12 }
 0x260   :  { %v687_v20 = vpop.f32.mrf.mxu0 }
 0x268   :  { %v695_v21 = vpop.f32.mrf.mxu0  ;;  %v763_v22 = vpop.f32.mrf.mxu1 }
 0x269   :  { %v764_v23 = vadd.f32 %v763_v22, %v687_v20  ;;  %v811_v24 = vpop.f32.mrf.mxu2  ;;  %v862_v25 = vpop.f32.mrf.mxu3 }
 0x26b   :  { %v812_v26 = vadd.f32 %v811_v24, %v764_v23 }
 0x26d   :  { %v863_v15 = vadd.f32 %v862_v25, %v812_v26 }
 0x270   :  { %v703_v28 = vpop.f32.mrf.mxu0  ;;  %v767_v30 = vpop.f32.mrf.mxu1 }
 0x271   :  { %v768_v31 = vadd.f32 %v767_v30, %v695_v21  ;;  %v816_v27 = vpop.f32.mrf.mxu2  ;;  %v868_v32 = vpop.f32.mrf.mxu3 }
 0x273   :  { %v817_v34 = vadd.f32 %v816_v27, %v768_v31 }
 0x275   :  { %v869_v35 = vadd.f32 %v868_v32, %v817_v34 }
 0x278   :  { %v711_v36 = vpop.f32.mrf.mxu0  ;;  %v771_v37 = vpop.f32.mrf.mxu1 }
 0x279   :  { %v772_v38 = vadd.f32 %v771_v37, %v703_v28  ;;  %v821_v40 = vpop.f32.mrf.mxu2  ;;  %v874_v41 = vpop.f32.mrf.mxu3  ;;  %v1267_v28 = vld [vmem:[%s1496_s2 + $0x10] sm:$0xff]  ;;  %v608_v37 = vmax.f32 %v1419_v2, 0.0 }
 0x27a   :  { %v1017_v30 = vsel %vm411_vm2, %v1267_v28, 0 }
 0x27b   :  { %v822_v42 = vadd.f32 %v821_v40, %v772_v38  ;;  %v1040_v32 = vand.u32 4294901760, %v1017_v30 }
 0x27d   :  { %v875_v43 = vadd.f32 %v874_v41, %v822_v42  ;;  %v1041_v40 = vsub.f32 %v1017_v30, %v1040_v32 }
 0x280   :  { %v719_v44 = vpop.f32.mrf.mxu0  ;;  %v775_v45 = vpop.f32.mrf.mxu1 }
 0x281   :  { %v826_v56 = vpop.f32.mrf.mxu2  ;;  %v880_v57 = vpop.f32.mrf.mxu3  ;;  %v776_v1 = vadd.f32 %v775_v45, %v711_v36  ;;  %v1270_v36 = vld [vmem:[%s1497_s3 + $0x18] sm:$0xff]  ;;  %v1042_v45 = vand.u32 4294901760, %v1041_v40 }
 0x282   :  { %1013 = vperm.xlu1 %1277, %v1270_v36  }
 0x283   :  { %v827_v5 = vadd.f32 %v826_v56, %v776_v1 }
 0x285   :  { %v881_v10 = vadd.f32 %v880_v57, %v827_v5 }
 0x288   :  { %v727_v46 = vpop.f32.mrf.mxu0  ;;  %v779_v47 = vpop.f32.mrf.mxu1 }
 0x289   :  { %v831_v61 = vpop.f32.mrf.mxu2  ;;  %v780_v62 = vadd.f32 %v779_v47, %v719_v44  ;;  %v886_v63 = vpop.f32.mrf.mxu3 }
 0x28b   :  { %v832_v4 = vadd.f32 %v831_v61, %v780_v62 }
 0x28d   :  { %v887_v8 = vadd.f32 %v886_v63, %v832_v4 }
 0x290   :  { %v783_v39 = vpop.f32.mrf.mxu1  ;;  %v922_v29 = vpop.f32.mrf.mxu0 }
 0x291   :  { %v923_v33 = vadd.f32 %v922_v29, %v863_v15  ;;  %v784_v6 = vadd.f32 %v783_v39, %v727_v46  ;;  %v836_v7 = vpop.f32.mrf.mxu2  ;;  %v892_v13 = vpop.f32.mrf.mxu3  ;;  %v1269_v39 = vld [vmem:[%s1497_s3 + $0x10] sm:$0xff] }
 0x292   :  { %1008 = vperm.xlu1 %1277, %v1269_v39  }
 0x293   :  { %v837_v11 = vadd.f32 %v836_v7, %v784_v6 }
 0x295   :  { %v893_v18 = vadd.f32 %v892_v13, %v837_v11 }
 0x298   :  { %v926_v48 = vpop.f32.mrf.mxu0  ;;  %v966_v49 = vpop.f32.mrf.mxu1 }
 0x299   :  { %v927_v50 = vadd.f32 %v926_v48, %v869_v35  ;;  %v1466_v51 = vadd.f32 %v966_v49, %v923_v33  ;;  %v1268_v35 = vld [vmem:[%s1496_s2 + $0x18] sm:$0xff]  ;;  %v1043_v48 = vsub.f32 %v1041_v40, %v1042_v45  ;;  %s1317_s2 = smov [#allocation2]  }
 0x29a   :  { %v1020_v41 = vsel %vm411_vm2, %v1268_v35, 0  ;;  %s1246_s3 = sshll.u32 %s1317_s2, 4  ;;  %s1247_s3 = int_to_ptr.vmem [resolvable:$true] %s1246_s3 }
 0x29b   :  { %v1048_v46 = vand.u32 4294901760, %v1020_v41 }
 0x29d   :  { %v1049_v49 = vsub.f32 %v1020_v41, %v1048_v46 }
 0x29f   :  { %v1050_v57 = vand.u32 4294901760, %v1049_v49 }
 0x2a0   :  { %v930_v52 = vpop.f32.mrf.mxu0  ;;  %v970_v53 = vpop.f32.mrf.mxu1 }
 0x2a1   :  { %v931_v54 = vadd.f32 %v930_v52, %v875_v43  ;;  %v1468_v55 = vadd.f32 %v970_v53, %v927_v50  ;;  %v1038_v43 = vand.u32 4294901760, %v608_v37  ;;  %v1051_v62 = vsub.f32 %v1049_v49, %v1050_v57 }
 0x2a3   :  { %v1078_v29 = vsub.f32 %v608_v37, %v1038_v43  ;;  %v1052_v1 = vand.u32 4294901760, %v1051_v62 }
 0x2a5   :  { %v1079_v56 = vand.u32 4294901760, %v1078_v29 }
 0x2a7   :  { %v1080_v61 = vsub.f32 %v1078_v29, %v1079_v56 }
 0x2a8   :  { %v934_v58 = vpop.f32.mrf.mxu0  ;;  %v974_v59 = vpop.f32.mrf.mxu1 }
 0x2a9   :  { %v1470_v60 = vadd.f32 %v974_v59, %v931_v54  ;;  %v935_v14 = vadd.f32 %v934_v58, %v881_v10  ;;  %v1044_v54 = vand.u32 4294901760, %v1043_v48 }
 0x2b0   :  { %v978_v0 = vpop.f32.mrf.mxu1  ;;  %v938_v3 = vpop.f32.mrf.mxu0 }
 0x2b1   :  { %v939_v12 = vadd.f32 %v938_v3, %v887_v8  ;;  %v979_v19 = vadd.f32 %v978_v0, %v935_v14  ;;  %v1081_v0 = vand.u32 4294901760, %v1080_v61 }
 0x2b3   :  { %v989_v23 = vmul.f32 %v979_v19, %v979_v19 }
 0x2b8   :  { %v982_v9 = vpop.f32.mrf.mxu1  ;;  %v942_v17 = vpop.f32.mrf.mxu0 }
 0x2b9   :  { %v983_v16 = vadd.f32 %v982_v9, %v939_v12  ;;  %v943_v20 = vadd.f32 %v942_v17, %v893_v18 }
 0x2bb   :  { %v990_v21 = vmul.f32 %v983_v16, %v983_v16 }
 0x2bd   :  { %v991_v25 = vadd.f32 %v990_v21, %v989_v23 }
 0x2c0   :  { %v986_v22 = vpop.f32.mrf.mxu1 }
 0x2c1   :  { %v987_v24 = vadd.f32 %v986_v22, %v943_v20 }
 0x2c3   :  { %v992_v26 = vmul.f32 %v987_v24, %v987_v24 }
 0x2c5   :  { %v993_v15 = vadd.f32 %v992_v26, %v991_v25 }
 0x2c7   :  { %1284 = vrsqrt.f32 %v993_v15  ;;  %vm1001_vm9 = vcmp.eq.f32.partialorder %v993_v15, inf  ;;  %v1004_v33 = vand.u32 2147483648, %v993_v15  ;;  %vm1003_vm10 = vcmp.eq.f32.partialorder %v993_v15, 0.0 }
 0x2cd   :  { %v1285_v31 = vpop.eup %1284 }
 0x2ce   :  { %v995_v27 = vmul.f32 %v1285_v31, %v993_v15 }
 0x2d0   :  { %v996_v34 = vmul.f32 %v1285_v31, %v995_v27 }
 0x2d2   :  { %v997_v38 = vmul.f32 0.5, %v996_v34 }
 0x2d4   :  { %v998_v42 = vsub.f32 1.5, %v997_v38 }
 0x2d6   :  { %v999_v44 = vmul.f32 %v1285_v31, %v998_v42 }
 0x2d8   :  { %v1000_v47 = vmul.f32 %v999_v44, %v993_v15 }
 0x2da   :  { %v1002_v2 = vsel %vm1001_vm9, %v993_v15, %v1000_v47 }
 0x2db   :  { %v1005_v50 = vsel %vm1003_vm10, %v1004_v33, %v1002_v2 }
 0x2dc   :  { %v1036_v52 = vand.u32 4294901760, %v1005_v50 }
 0x2de   :  { %1037 = vmatpush.msrb.mxu2 %v1036_v52  ;;  %v1072_v53 = vsub.f32 %v1005_v50, %v1036_v52 }
 0x2e0   :  { %1039 = vmatpush.msrb.mxu2 %v1038_v43  ;;  %v1073_v58 = vand.u32 4294901760, %v1072_v53 }
 0x2e1   :  { %1045 = vmatmul.f32.vlgmr.msrb.gmra.mxu2 %v1044_v54 }
 0x2e2   :  { %1108 = vmatpush.msra.mxu2 %v1072_v53  ;;  %v1074_v59 = vsub.f32 %v1072_v53, %v1073_v58 }
 0x2e4   :  { %1111 = vmatpush.msra.mxu2 %v1078_v29  ;;  %v1075_v63 = vand.u32 4294901760, %v1074_v59 }
 0x2e6   :  { %1171 = vmatpush.msrb.mxu2 %v1073_v58  ;;  %1076 = vmatpush.msrb.mxu3 %v1075_v63 }
 0x2e8   :  { %1175 = vmatpush.msrb.mxu2 %v1079_v56  ;;  %1082 = vmatpush.msrb.mxu3 %v1081_v0 }
 0x2e9   :  { %1084 = vmatmul.f32.vlgmr.msrb.gmra.mxu3 %v1040_v32  ;;  %1053 = vmatmul.f32.gmra.mxu2 %v1052_v1 }
 0x2ea   :  { %1138 = vmatpush.msra.mxu3 %v1036_v52 }
 0x2ec   :  { %1140 = vmatpush.msra.mxu3 %v1038_v43 }
 0x2ee   :  { %1200 = vmatpush.msrb.mxu3 %v1036_v52 }
 0x2f0   :  { %1202 = vmatpush.msrb.mxu3 %v1038_v43 }
 0x2f1   :  { %1088 = vmatmul.f32.gmra.mxu3 %v1048_v46  ;;  %1114 = vmatmul.f32.vlgmr.msra.gmra.mxu2 %v1041_v40 }
 0x2f4   :  { %v1014_v7 = vpop.permute.xlu1 %1013 }
 0x2f9   :  { %1144 = vmatmul.f32.vlgmr.msra.gmra.mxu3 %v1042_v45  ;;  %1119 = vmatmul.f32.gmra.mxu2 %v1049_v49 }
 0x301   :  { %1150 = vmatmul.f32.gmra.mxu3 %v1050_v57  ;;  %1177 = vmatmul.f32.vlgmr.msrb.gmra.mxu2 %v1040_v32 }
 0x304   :  { %v1009_v11 = vpop.permute.xlu1 %1008 }
 0x309   :  { %1204 = vmatmul.f32.vlgmr.msrb.gmra.mxu3 %v1040_v32  ;;  %1181 = vmatmul.f32.gmra.mxu2 %v1048_v46 }
 0x311   :  { %1208 = vmatmul.f32.gmra.mxu3 %v1048_v46 }
 0x364   :  { %v1046_v3 = vpop.f32.mrf.mxu2 }
 0x365   :  { %v1047_v12 = vadd.f32 %v1046_v3, %v1009_v11 }
 0x36c   :  { %v1085_v4 = vpop.f32.mrf.mxu3  ;;  %v1054_v5 = vpop.f32.mrf.mxu2 }
 0x36d   :  { %v1086_v14 = vadd.f32 %v1085_v4, %v1047_v12  ;;  %v1055_v18 = vadd.f32 %v1054_v5, %v1014_v7 }
 0x374   :  { %v1089_v6 = vpop.f32.mrf.mxu3  ;;  %v1115_v8 = vpop.f32.mrf.mxu2 }
 0x375   :  { %v1116_v17 = vadd.f32 %v1115_v8, %v1086_v14  ;;  %v1090_v22 = vadd.f32 %v1089_v6, %v1055_v18 }
 0x37c   :  { %v1145_v9 = vpop.f32.mrf.mxu3  ;;  %v1120_v10 = vpop.f32.mrf.mxu2 }
 0x37d   :  { %v1146_v19 = vadd.f32 %v1145_v9, %v1116_v17  ;;  %v1121_v24 = vadd.f32 %v1120_v10, %v1090_v22 }
 0x384   :  { %v1151_v13 = vpop.f32.mrf.mxu3  ;;  %v1178_v16 = vpop.f32.mrf.mxu2 }
 0x385   :  { %v1179_v20 = vadd.f32 %v1178_v16, %v1146_v19  ;;  %v1152_v15 = vadd.f32 %v1151_v13, %v1121_v24 }
 0x38c   :  { %v1205_v21 = vpop.f32.mrf.mxu3  ;;  %v1182_v26 = vpop.f32.mrf.mxu2 }
 0x38d   :  { %v1206_v23 = vadd.f32 %v1205_v21, %v1179_v20  ;;  %v1183_v28 = vadd.f32 %v1182_v26, %v1152_v15 }
 0x38f   :  { %v1212_v25 = vmax.f32 %v1206_v23, 0.0 }
 0x391   :  { %1239 = vst [vmem:[#allocation2] sm:$0xff] %v1212_v25 }
 0x394   :  { %v1209_v30 = vpop.f32.mrf.mxu3 }
 0x395   :  { %v1210_v31 = vadd.f32 %v1209_v30, %v1183_v28 }
 0x397   :  { %v1271_v27 = vmul.f32 -1.442695, %v1210_v31 }
 0x399   :  { %1286 = vpow2.f32 %v1271_v27 }
 0x39f   :  { %v1287_v32 = vpop.eup %1286 }
 0x3a0   :  { %v1216_v34 = vadd.f32 1.0, %v1287_v32 }
 0x3a2   :  { %1288 = vrcp.f32 %v1216_v34  ;;  %v1228_v38 = vand.u32 2147483648, %v1216_v34  ;;  %v1226_v41 = vand.u32 2147483647, %v1216_v34  ;;  %vm1222_vm12 = vweird.f32 %v1216_v34 }
 0x3a4   :  { %v1229_v43 = vor.u32 1.1754944e-38, %v1228_v38  ;;  %vm1227_vm14 = vcmp.eq.f32.partialorder %v1226_v41, 8.507059e+37 }
 0x3a8   :  { %v1289_v35 = vpop.eup %1288 }
 0x3a9   :  { %v1218_v36 = vmul.f32 %v1289_v35, %v1216_v34  ;;  %vm1223_vm11 = vweird.f32 %v1289_v35 }
 0x3aa   :  { %vm1224_vm13 = vmor %vm1222_vm12, %vm1223_vm11 }
 0x3ab   :  { %v1219_v37 = vsub.f32 1.0, %v1218_v36 }
 0x3ad   :  { %v1220_v40 = vmul.f32 %v1289_v35, %v1219_v37 }
 0x3af   :  { %v1221_v42 = vadd.f32 %v1289_v35, %v1220_v40 }
 0x3b1   :  { %v1225_v44 = vsel %vm1224_vm13, %v1289_v35, %v1221_v42 }
 0x3b2   :  { %v1230_v45 = vsel %vm1227_vm14, %v1229_v43, %v1225_v44 }
 0x3b3   :  { %v1233_v46 = vmul.f32 %v1230_v45, %v1468_v55  ;;  %v1234_v47 = vmul.f32 %v1230_v45, %v1470_v60  ;;  %v1232_v39 = vmul.f32 %v1230_v45, %v1466_v51 }
 0x3b5   :  { %v1236_v29 = vrot.slane %v1233_v46, 4  ;;  %1241 = vst [vmem:[#allocation2 + $0x10] sm:$0xf] %v1234_v47 }
 0x3b7   :  { %v1238_v33 = vsel %vm24_vm0, %v1232_v39, %v1236_v29 }
 0x3b8   :  { %1240 = vst [vmem:[#allocation2 + $0x8] sm:$0xff] %v1238_v33 }
 0x3b9   :  { %1254 = dma.vmem_to_hbm [thread:$0]  %s1247_s3, 384, %s1249_s9, [#allocation3], %s1318_s10, %s1318_s10, %s1319_s11  }
 0x3ba   :  { %1314 = dma.done.wait [#allocation3], 384  }
 0x3bb   :  { %1315 = vsyncadd [#allocation3], 4294966912 }
 0x3bc   :  { %1259 = vsyncpa [#allocation3], 1 }

</bundles_post_ra>
